<compile_context>
chip_gen: v7x
topology: tpu7x:2x2x1
jax: 0.10.0
libtpu: 0.0.40
codegen_flags: <defaults>
</compile_context>

<pallas_src>
import math

import jax
import jax.numpy as jnp
from jax.experimental import pallas as pl
from jax.experimental.pallas import tpu as pltpu


def _choose_heads_per_group(num_heads, d_k, seq_len,
                            lane_target=256, score_budget_bytes=16 * 2**20):
    """Smallest divisor G of num_heads with G*d_k >= lane_target (else all heads),
    stepped down so the (G, S, S) f32 softmax temporaries stay within budget."""
    divisors = [g for g in range(1, num_heads + 1) if num_heads % g == 0]
    pick = divisors[-1]
    for g in divisors:
        if g * d_k >= lane_target:
            pick = g
            break
    while pick > 1 and 3 * pick * seq_len * seq_len * 4 > score_budget_bytes:
        smaller = [g for g in divisors if g < pick]
        pick = smaller[-1] if smaller else 1
    return pick


def _vmem_limit_bytes(S, D, d_k, G, n_groups, has_bias):
    """Rough per-step VMEM working set -> explicit scoped-VMEM limit."""
    est = 0
    est += 3 * S * D * 2 * 2                       # Q/K/V bf16 blocks, double-buffered
    if has_bias:
        est += S * S * 2 * 2                       # bf16 additive mask bias
    est += 4 * n_groups * G * D * d_k * 2 * 2      # resident weight blocks
    est += S * D * 4 * 2                           # f32 output block
    est += S * D * 4                               # f32 accumulator scratch
    est += (3 * G * S * S + 6 * G * S * d_k + 2 * G * S * D) * 4  # in-kernel temporaries
    est = int(est * 2)                             # headroom for compiler temporaries
    try:
        cap = pltpu.get_tpu_info().vmem_capacity_bytes
    except Exception:
        cap = 64 * 1024 * 1024                     # conservative: v7x per-core VMEM
    return int(min(max(est, 32 * 1024 * 1024), int(0.75 * cap)))


def _make_mha_kernel(has_bias, approx_recip):
    """Per-(batch, head-group) kernel body.  Grid = (B, n_groups)."""

    def kernel(*refs):
        if has_bias:
            (q_ref, k_ref, v_ref, bias_ref,
             wq_ref, wk_ref, wv_ref, wo_ref, bo_ref, o_ref, acc_ref) = refs
        else:
            (q_ref, k_ref, v_ref,
             wq_ref, wk_ref, wv_ref, wo_ref, bo_ref, o_ref, acc_ref) = refs
            bias_ref = None

        g = pl.program_id(1)
        f32, bf16 = jnp.float32, jnp.bfloat16

        xq = q_ref[0]                      # (S, D)   bf16
        xk = k_ref[0]
        xv = v_ref[0]

        # Resident weights; dynamic leading-axis slice selects this head group.
        wq = wq_ref[g]                     # (G, D, d_k) bf16, 1/sqrt(d_k) folded in
        wk = wk_ref[g]                     # (G, D, d_k) bf16
        wv = wv_ref[g]                     # (G, D, d_k) bf16
        wo = wo_ref[g]                     # (G, d_k, D) bf16

        G, _, d_k = wq.shape
        S, D = xq.shape

        # Head-major projections as leading-batch MXU contractions over D.
        xq_b = jnp.broadcast_to(xq, (G, S, D))
        xk_b = jnp.broadcast_to(xk, (G, S, D))
        xv_b = jnp.broadcast_to(xv, (G, S, D))
        qh = jnp.einsum('gsd,gdk->gsk', xq_b, wq, preferred_element_type=f32)
        kh = jnp.einsum('gsd,gdk->gsk', xk_b, wk, preferred_element_type=f32)
        vh = jnp.einsum('gsd,gdk->gsk', xv_b, wv, preferred_element_type=f32)

        # scores = (Q_h * scale) @ K_h^T   (scale already folded into W_q)
        scores = jnp.einsum('gqd,gkd->gqk', qh.astype(bf16), kh.astype(bf16),
                            preferred_element_type=f32)          # (G, S, S) f32
        if has_bias:
            scores = scores + bias_ref[0].astype(f32)            # additive 0 / -1e20

        # Numerically-stable softmax in f32; reciprocal on the EUP.
        m = jnp.max(scores, axis=-1, keepdims=True)
        e = jnp.exp(scores - m)
        denom = jnp.sum(e, axis=-1, keepdims=True)
        if approx_recip:
            probs = e * pl.reciprocal(denom, approx=True)
        else:
            probs = e / denom

        ctx = jnp.einsum('gqk,gkd->gqd', probs.astype(bf16), vh.astype(bf16),
                         preferred_element_type=f32)             # (G, S, d_k)

        # Head-combine folded into the output projection; sum over the G heads.
        part = jnp.einsum('gsk,gkn->gsn', ctx.astype(bf16), wo,
                          preferred_element_type=f32)            # (G, S, D)
        part = jnp.sum(part, axis=0)                             # (S, D) f32

        @pl.when(g == 0)
        def _init():
            acc_ref[...] = part

        @pl.when(g > 0)
        def _accum():
            acc_ref[...] = acc_ref[...] + part

        @pl.when(g == pl.num_programs(1) - 1)
        def _emit():
            o_ref[0] = acc_ref[...] + bo_ref[...]                # bo (1, D) broadcasts

    return kernel


def multi_head_attention(Q, K, V, params, num_heads, mask=None,
                         approx_softmax_recip=True):
    """Pallas MultiHeadAttention forward.

    Q, K, V: (B, S, D) float32.
    params = (wq, wk, wv, wo, bo) with PyTorch Linear layout:
        wq/wk/wv/wo: (out_features, in_features), bo: (out_features,)
        (W_q/W_k/W_v have no bias in the reference module.)
    mask: optional, broadcastable to (B, S, S); 0 entries are masked out.
    """
    B, S, D = Q.shape
    assert D % num_heads == 0
    d_k = D // num_heads

    wq, wk, wv, wo, bo = params
    bf16, f32 = jnp.bfloat16, jnp.float32

    G = _choose_heads_per_group(num_heads, d_k, S)
    n_groups = num_heads // G
    scale = 1.0 / math.sqrt(d_k)

    # Pre-transpose, scale-fold and group weights once in XLA.
    def split_in_proj(w, s=1.0):           # (D_out, D_in) -> (n_groups, G, D_in, d_k)
        wt = w.T * s                        # (D, D)
        wt = wt.reshape(D, num_heads, d_k).transpose(1, 0, 2)   # (H, D, d_k)
        return wt.reshape(n_groups, G, D, d_k).astype(bf16)

    wq_g = split_in_proj(wq, scale)         # scale folded -> no per-step rescale
    wk_g = split_in_proj(wk)
    wv_g = split_in_proj(wv)
    wo_g = wo.T.reshape(num_heads, d_k, D).reshape(n_groups, G, d_k, D).astype(bf16)
    bo2d = bo.reshape(1, D).astype(f32)

    Qb, Kb, Vb = Q.astype(bf16), K.astype(bf16), V.astype(bf16)
    has_bias = mask is not None

    args = [Qb, Kb, Vb]
    in_specs = [
        pl.BlockSpec((1, S, D), lambda b, g: (b, 0, 0)),     # Q
        pl.BlockSpec((1, S, D), lambda b, g: (b, 0, 0)),     # K
        pl.BlockSpec((1, S, D), lambda b, g: (b, 0, 0)),     # V
    ]

    if has_bias:
        m = jnp.asarray(mask)
        if m.ndim == 4:
            if m.shape[1] != 1:
                raise ValueError(
                    "per-head masks (B, H>1, S, S) are not supported; "
                    "only batch-broadcastable masks.")
            m = m[:, 0]
        if m.ndim == 2:
            m = m[None]
        # Compact bf16 additive bias (0 / -1e20) instead of an f32 stream.
        bias = jnp.where(m == 0, -1e20, 0.0).astype(bf16)
        bias = jnp.broadcast_to(bias, (B, S, S))
        args.append(bias)
        in_specs.append(pl.BlockSpec((1, S, S), lambda b, g: (b, 0, 0)))

    args += [wq_g, wk_g, wv_g, wo_g, bo2d]
    # Constant index_map -> weights DMA'd once and stay resident in VMEM.
    in_specs += [
        pl.BlockSpec((n_groups, G, D, d_k), lambda b, g: (0, 0, 0, 0)),  # W_q (grouped)
        pl.BlockSpec((n_groups, G, D, d_k), lambda b, g: (0, 0, 0, 0)),  # W_k
        pl.BlockSpec((n_groups, G, D, d_k), lambda b, g: (0, 0, 0, 0)),  # W_v
        pl.BlockSpec((n_groups, G, d_k, D), lambda b, g: (0, 0, 0, 0)),  # W_o
        pl.BlockSpec((1, D),                lambda b, g: (0, 0)),        # b_o
    ]

    kernel = _make_mha_kernel(has_bias=has_bias, approx_recip=approx_softmax_recip)

    grid_spec = pltpu.PrefetchScalarGridSpec(
        num_scalar_prefetch=0,
        grid=(B, n_groups),                            # head-group axis = reduction, last
        in_specs=in_specs,
        out_specs=pl.BlockSpec((1, S, D), lambda b, g: (b, 0, 0)),
        scratch_shapes=[pltpu.VMEM((S, D), f32)],      # head accumulator
    )

    return pl.pallas_call(
        kernel,
        out_shape=jax.ShapeDtypeStruct((B, S, D), f32),
        grid_spec=grid_spec,
        compiler_params=pltpu.CompilerParams(
            dimension_semantics=("parallel", "arbitrary"),
            vmem_limit_bytes=_vmem_limit_bytes(S, D, d_k, G, n_groups, has_bias)),
    )(*args)


def _reference_mha(Q, K, V, params, num_heads, mask=None):
    """Pure-JAX f32 reference mirroring the PyTorch module exactly."""
    wq, wk, wv, wo, bo = params
    B, S, D = Q.shape
    d_k = D // num_heads

    def split(x):
        return x.reshape(B, S, num_heads, d_k).transpose(0, 2, 1, 3)

    q = split(Q @ wq.T)
    k = split(K @ wk.T)
    v = split(V @ wv.T)
    scores = jnp.einsum('bhqd,bhkd->bhqk', q, k) / math.sqrt(d_k)
    if mask is not None:
        scores = jnp.where(mask == 0, -1e20, scores)
    probs = jax.nn.softmax(scores, axis=-1)
    ctx = jnp.einsum('bhqk,bhkd->bhqd', probs, v)
    ctx = ctx.transpose(0, 2, 1, 3).reshape(B, S, D)
    return ctx @ wo.T + bo


if __name__ == "__main__":
    # Small shapes consistent with the module: batch=2, seq=8, d_model=32, heads=4
    B, S, D, H = 2, 8, 32, 4

    key = jax.random.PRNGKey(0)
    kq, kk, kv, kwq, kwk, kwv, kwo, kbo = jax.random.split(key, 8)

    # PyTorch-Linear-like init: U(-1/sqrt(D), 1/sqrt(D))
    bound = 1.0 / math.sqrt(D)
    wq = jax.random.uniform(kwq, (D, D), jnp.float32, -bound, bound)
    wk = jax.random.uniform(kwk, (D, D), jnp.float32, -bound, bound)
    wv = jax.random.uniform(kwv, (D, D), jnp.float32, -bound, bound)
    wo = jax.random.uniform(kwo, (D, D), jnp.float32, -bound, bound)
    bo = jax.random.uniform(kbo, (D,),   jnp.float32, -bound, bound)
    params = (wq, wk, wv, wo, bo)

    Q = jax.random.normal(kq, (B, S, D), jnp.float32)
    K = jax.random.normal(kk, (B, S, D), jnp.float32)
    V = jax.random.normal(kv, (B, S, D), jnp.float32)

    # --- no mask ---------------------------------------------------------
    out = multi_head_attention(Q, K, V, params, num_heads=H, mask=None)
    out = jax.block_until_ready(out)
    ref = _reference_mha(Q, K, V, params, num_heads=H, mask=None)
    assert out.shape == (B, S, D)
    assert jnp.allclose(out, ref, atol=2e-2, rtol=2e-2), "mismatch (no mask)"

    # --- per-batch mask: batch 0 causal, batch 1 full --------------------
    causal = jnp.tril(jnp.ones((S, S), jnp.int32))
    full = jnp.ones((S, S), jnp.int32)
    mask = jnp.stack([causal, full])[:, None]                # (B, 1, S, S)
    out_m = multi_head_attention(Q, K, V, params, num_heads=H, mask=mask)
    out_m = jax.block_until_ready(out_m)
    ref_m = _reference_mha(Q, K, V, params, num_heads=H, mask=mask)
    assert jnp.allclose(out_m, ref_m, atol=2e-2, rtol=2e-2), "mismatch (masked)"

    print("KERNEL_OK")
</pallas_src>

<mosaic_0001>
module attributes {stable_mosaic.version = 11 : i64} {
  func.func @kernel(%arg0: i32, %arg1: i32, %arg2: memref<1x8x32xbf16, #tpu.memory_space<vmem>>, %arg3: memref<1x8x32xbf16, #tpu.memory_space<vmem>>, %arg4: memref<1x8x32xbf16, #tpu.memory_space<vmem>>, %arg5: memref<1x4x32x8xbf16, #tpu.memory_space<vmem>>, %arg6: memref<1x4x32x8xbf16, #tpu.memory_space<vmem>>, %arg7: memref<1x4x32x8xbf16, #tpu.memory_space<vmem>>, %arg8: memref<1x4x8x32xbf16, #tpu.memory_space<vmem>>, %arg9: memref<1x32xf32, #tpu.memory_space<vmem>>, %arg10: memref<1x8x32xf32, #tpu.memory_space<vmem>>, %arg11: memref<8x32xf32, #tpu.memory_space<vmem>>) attributes {dimension_semantics = [#tpu.dimension_semantics<parallel>, #tpu.dimension_semantics<arbitrary>], iteration_bounds = array<i64: 2, 1>, scalar_prefetch = 0 : i64, scratch_operands = 1 : i64, tpu.core_type = #tpu.core_type<tc>, window_params = [{transform_indices = @transform_0, window_bounds = array<i64: 1, 8, 32>}, {transform_indices = @transform_1, window_bounds = array<i64: 1, 8, 32>}, {transform_indices = @transform_2, window_bounds = array<i64: 1, 8, 32>}, {pipeline_mode = #tpu.pipeline_mode<synchronous>, transform_indices = @transform_3, window_bounds = array<i64: 1, 4, 32, 8>}, {pipeline_mode = #tpu.pipeline_mode<synchronous>, transform_indices = @transform_4, window_bounds = array<i64: 1, 4, 32, 8>}, {pipeline_mode = #tpu.pipeline_mode<synchronous>, transform_indices = @transform_5, window_bounds = array<i64: 1, 4, 32, 8>}, {pipeline_mode = #tpu.pipeline_mode<synchronous>, transform_indices = @transform_6, window_bounds = array<i64: 1, 4, 8, 32>}, {pipeline_mode = #tpu.pipeline_mode<synchronous>, transform_indices = @transform_7, window_bounds = array<i64: 1, 32>}, {transform_indices = @transform_8, window_bounds = array<i64: 1, 8, 32>}]} {
    %c0 = arith.constant 0 : index
    %c0_0 = arith.constant 0 : index
    %c0_1 = arith.constant 0 : index
    %0 = vector.load %arg2[%c0, %c0_0, %c0_1] : memref<1x8x32xbf16, #tpu.memory_space<vmem>>, vector<1x8x32xbf16>
    %1 = vector.shape_cast %0 : vector<1x8x32xbf16> to vector<8x32xbf16>
    %c0_2 = arith.constant 0 : index
    %c0_3 = arith.constant 0 : index
    %c0_4 = arith.constant 0 : index
    %2 = vector.load %arg3[%c0_2, %c0_3, %c0_4] : memref<1x8x32xbf16, #tpu.memory_space<vmem>>, vector<1x8x32xbf16>
    %3 = vector.shape_cast %2 : vector<1x8x32xbf16> to vector<8x32xbf16>
    %c0_5 = arith.constant 0 : index
    %c0_6 = arith.constant 0 : index
    %c0_7 = arith.constant 0 : index
    %4 = vector.load %arg4[%c0_5, %c0_6, %c0_7] : memref<1x8x32xbf16, #tpu.memory_space<vmem>>, vector<1x8x32xbf16>
    %5 = vector.shape_cast %4 : vector<1x8x32xbf16> to vector<8x32xbf16>
    %6 = arith.index_cast %arg1 : i32 to index
    %c0_8 = arith.constant 0 : index
    %c0_9 = arith.constant 0 : index
    %c0_10 = arith.constant 0 : index
    %7 = vector.load %arg5[%6, %c0_8, %c0_9, %c0_10] : memref<1x4x32x8xbf16, #tpu.memory_space<vmem>>, vector<1x4x32x8xbf16>
    %8 = vector.shape_cast %7 : vector<1x4x32x8xbf16> to vector<4x32x8xbf16>
    %9 = arith.index_cast %arg1 : i32 to index
    %c0_11 = arith.constant 0 : index
    %c0_12 = arith.constant 0 : index
    %c0_13 = arith.constant 0 : index
    %10 = vector.load %arg6[%9, %c0_11, %c0_12, %c0_13] : memref<1x4x32x8xbf16, #tpu.memory_space<vmem>>, vector<1x4x32x8xbf16>
    %11 = vector.shape_cast %10 : vector<1x4x32x8xbf16> to vector<4x32x8xbf16>
    %12 = arith.index_cast %arg1 : i32 to index
    %c0_14 = arith.constant 0 : index
    %c0_15 = arith.constant 0 : index
    %c0_16 = arith.constant 0 : index
    %13 = vector.load %arg7[%12, %c0_14, %c0_15, %c0_16] : memref<1x4x32x8xbf16, #tpu.memory_space<vmem>>, vector<1x4x32x8xbf16>
    %14 = vector.shape_cast %13 : vector<1x4x32x8xbf16> to vector<4x32x8xbf16>
    %15 = arith.index_cast %arg1 : i32 to index
    %c0_17 = arith.constant 0 : index
    %c0_18 = arith.constant 0 : index
    %c0_19 = arith.constant 0 : index
    %16 = vector.load %arg8[%15, %c0_17, %c0_18, %c0_19] : memref<1x4x8x32xbf16, #tpu.memory_space<vmem>>, vector<1x4x8x32xbf16>
    %17 = vector.shape_cast %16 : vector<1x4x8x32xbf16> to vector<4x8x32xbf16>
    %18 = vector.shape_cast %1 : vector<8x32xbf16> to vector<1x8x32xbf16>
    %19 = vector.broadcast %18 : vector<1x8x32xbf16> to vector<4x8x32xbf16>
    %20 = vector.shape_cast %3 : vector<8x32xbf16> to vector<1x8x32xbf16>
    %21 = vector.broadcast %20 : vector<1x8x32xbf16> to vector<4x8x32xbf16>
    %22 = vector.shape_cast %5 : vector<8x32xbf16> to vector<1x8x32xbf16>
    %23 = vector.broadcast %22 : vector<1x8x32xbf16> to vector<4x8x32xbf16>
    "tpu.trace_start"() <{level = 10 : i32, message = "gsd,gdk->gsk"}> : () -> ()
    %cst = arith.constant dense<0.000000e+00> : vector<4x8x8xf32>
    %24 = tpu.matmul %19, %8, %cst {dimension_numbers = #tpu.dot_dimension_numbers<[2], [1], [1], [2], [0, 0, 0, 1, 1, 2], [0], [0]>} : vector<4x8x32xbf16>, vector<4x32x8xbf16>, vector<4x8x8xf32> -> vector<4x8x8xf32>
    %cst_20 = arith.constant dense<0.000000e+00> : vector<4x8x8xf32>
    %25 = tpu.matmul %21, %11, %cst_20 {dimension_numbers = #tpu.dot_dimension_numbers<[2], [1], [1], [2], [0, 0, 0, 1, 1, 2], [0], [0]>} : vector<4x8x32xbf16>, vector<4x32x8xbf16>, vector<4x8x8xf32> -> vector<4x8x8xf32>
    %cst_21 = arith.constant dense<0.000000e+00> : vector<4x8x8xf32>
    %26 = tpu.matmul %23, %14, %cst_21 {dimension_numbers = #tpu.dot_dimension_numbers<[2], [1], [1], [2], [0, 0, 0, 1, 1, 2], [0], [0]>} : vector<4x8x32xbf16>, vector<4x32x8xbf16>, vector<4x8x8xf32> -> vector<4x8x8xf32>
    "tpu.trace_stop"() : () -> ()
    %27 = arith.truncf %24 : vector<4x8x8xf32> to vector<4x8x8xbf16>
    %28 = arith.truncf %25 : vector<4x8x8xf32> to vector<4x8x8xbf16>
    "tpu.trace_start"() <{level = 10 : i32, message = "gqd,gkd->gqk"}> : () -> ()
    %cst_22 = arith.constant dense<0.000000e+00> : vector<4x8x8xf32>
    %29 = tpu.matmul %27, %28, %cst_22 {dimension_numbers = #tpu.dot_dimension_numbers<[2], [2], [1], [1], [0, 0, 0, 1, 1, 1], [0], [0]>} : vector<4x8x8xbf16>, vector<4x8x8xbf16>, vector<4x8x8xf32> -> vector<4x8x8xf32>
    "tpu.trace_stop"() : () -> ()
    %cst_23 = arith.constant dense<0xFF800000> : vector<4x8xf32>
    %30 = vector.multi_reduction <maximumf>, %29, %cst_23 [2] : vector<4x8x8xf32> to vector<4x8xf32>
    %31 = vector.shape_cast %30 : vector<4x8xf32> to vector<4x8x1xf32>
    %32 = vector.broadcast %31 : vector<4x8x1xf32> to vector<4x8x8xf32>
    %33 = arith.subf %29, %32 : vector<4x8x8xf32>
    %34 = math.exp %33 : vector<4x8x8xf32>
    %cst_24 = arith.constant dense<0.000000e+00> : vector<4x8xf32>
    %35 = vector.multi_reduction <add>, %34, %cst_24 [2] : vector<4x8x8xf32> to vector<4x8xf32>
    %36 = vector.shape_cast %35 : vector<4x8xf32> to vector<4x8x1xf32>
    %37 = tpu.reciprocal %36 {approx = true} : vector<4x8x1xf32> -> vector<4x8x1xf32>
    %38 = vector.broadcast %37 : vector<4x8x1xf32> to vector<4x8x8xf32>
    %39 = arith.mulf %34, %38 : vector<4x8x8xf32>
    %40 = arith.truncf %39 : vector<4x8x8xf32> to vector<4x8x8xbf16>
    %41 = arith.truncf %26 : vector<4x8x8xf32> to vector<4x8x8xbf16>
    "tpu.trace_start"() <{level = 10 : i32, message = "gqk,gkd->gqd"}> : () -> ()
    %cst_25 = arith.constant dense<0.000000e+00> : vector<4x8x8xf32>
    %42 = tpu.matmul %40, %41, %cst_25 {dimension_numbers = #tpu.dot_dimension_numbers<[2], [1], [1], [2], [0, 0, 0, 1, 1, 2], [0], [0]>} : vector<4x8x8xbf16>, vector<4x8x8xbf16>, vector<4x8x8xf32> -> vector<4x8x8xf32>
    "tpu.trace_stop"() : () -> ()
    %43 = arith.truncf %42 : vector<4x8x8xf32> to vector<4x8x8xbf16>
    "tpu.trace_start"() <{level = 10 : i32, message = "gsk,gkn->gsn"}> : () -> ()
    %cst_26 = arith.constant dense<0.000000e+00> : vector<4x8x32xf32>
    %44 = tpu.matmul %43, %17, %cst_26 {dimension_numbers = #tpu.dot_dimension_numbers<[2], [1], [1], [2], [0, 0, 0, 1, 1, 2], [0], [0]>} : vector<4x8x8xbf16>, vector<4x8x32xbf16>, vector<4x8x32xf32> -> vector<4x8x32xf32>
    "tpu.trace_stop"() : () -> ()
    %cst_27 = arith.constant dense<0.000000e+00> : vector<8x32xf32>
    %45 = vector.multi_reduction <add>, %44, %cst_27 [0] : vector<4x8x32xf32> to vector<8x32xf32>
    %c0_i32 = arith.constant 0 : i32
    %46 = arith.cmpi eq, %arg1, %c0_i32 : i32
    %47 = arith.extui %46 : i1 to i32
    %c0_i32_28 = arith.constant 0 : i32
    %48 = arith.cmpi ne, %47, %c0_i32_28 : i32
    scf.if %48 {
      %c0_33 = arith.constant 0 : index
      %c0_34 = arith.constant 0 : index
      %55 = vector.load %arg11[%c0_33, %c0_34] : memref<8x32xf32, #tpu.memory_space<vmem>>, vector<8x32xf32>
      tpu.vector_store %arg11[%c0_33, %c0_34], %45 {strides = array<i32>} : memref<8x32xf32, #tpu.memory_space<vmem>>, vector<8x32xf32>,
    } else {
    }
    %c0_i32_29 = arith.constant 0 : i32
    %49 = arith.cmpi sgt, %arg1, %c0_i32_29 : i32
    %50 = arith.extui %49 : i1 to i32
    %c0_i32_30 = arith.constant 0 : i32
    %51 = arith.cmpi ne, %50, %c0_i32_30 : i32
    scf.if %51 {
      %c0_33 = arith.constant 0 : index
      %c0_34 = arith.constant 0 : index
      %55 = vector.load %arg11[%c0_33, %c0_34] : memref<8x32xf32, #tpu.memory_space<vmem>>, vector<8x32xf32>
      %56 = arith.addf %55, %45 : vector<8x32xf32>
      %c0_35 = arith.constant 0 : index
      %c0_36 = arith.constant 0 : index
      %57 = vector.load %arg11[%c0_35, %c0_36] : memref<8x32xf32, #tpu.memory_space<vmem>>, vector<8x32xf32>
      tpu.vector_store %arg11[%c0_35, %c0_36], %56 {strides = array<i32>} : memref<8x32xf32, #tpu.memory_space<vmem>>, vector<8x32xf32>,
    } else {
    }
    %c0_i32_31 = arith.constant 0 : i32
    %52 = arith.cmpi eq, %arg1, %c0_i32_31 : i32
    %53 = arith.extui %52 : i1 to i32
    %c0_i32_32 = arith.constant 0 : i32
    %54 = arith.cmpi ne, %53, %c0_i32_32 : i32
    scf.if %54 {
      %c0_33 = arith.constant 0 : index
      %c0_34 = arith.constant 0 : index
      %55 = vector.load %arg11[%c0_33, %c0_34] : memref<8x32xf32, #tpu.memory_space<vmem>>, vector<8x32xf32>
      %c0_35 = arith.constant 0 : index
      %c0_36 = arith.constant 0 : index
      %56 = vector.load %arg9[%c0_35, %c0_36] : memref<1x32xf32, #tpu.memory_space<vmem>>, vector<1x32xf32>
      %57 = vector.broadcast %56 : vector<1x32xf32> to vector<8x32xf32>
      %58 = arith.addf %55, %57 : vector<8x32xf32>
      %c0_37 = arith.constant 0 : index
      %c0_38 = arith.constant 0 : index
      %c0_39 = arith.constant 0 : index
      %59 = vector.load %arg10[%c0_37, %c0_38, %c0_39] : memref<1x8x32xf32, #tpu.memory_space<vmem>>, vector<1x8x32xf32>
      %60 = vector.shape_cast %59 : vector<1x8x32xf32> to vector<8x32xf32>
      %61 = vector.shape_cast %58 : vector<8x32xf32> to vector<1x8x32xf32>
      tpu.vector_store %arg10[%c0_37, %c0_38, %c0_39], %61 {strides = array<i32>} : memref<1x8x32xf32, #tpu.memory_space<vmem>>, vector<1x8x32xf32>,
    } else {
    }
    return
  }
  func.func @transform_0(%arg0: i32, %arg1: i32) -> (i32, i32, i32) {
    %c0_i32 = arith.constant 0 : i32
    %c0_i32_0 = arith.constant 0 : i32
    %c0_i32_1 = arith.constant 0 : i32
    return %arg0, %c0_i32, %c0_i32_0 : i32, i32, i32
  }
  func.func @transform_1(%arg0: i32, %arg1: i32) -> (i32, i32, i32) {
    %c0_i32 = arith.constant 0 : i32
    %c0_i32_0 = arith.constant 0 : i32
    %c0_i32_1 = arith.constant 0 : i32
    return %arg0, %c0_i32, %c0_i32_0 : i32, i32, i32
  }
  func.func @transform_2(%arg0: i32, %arg1: i32) -> (i32, i32, i32) {
    %c0_i32 = arith.constant 0 : i32
    %c0_i32_0 = arith.constant 0 : i32
    %c0_i32_1 = arith.constant 0 : i32
    return %arg0, %c0_i32, %c0_i32_0 : i32, i32, i32
  }
  func.func @transform_3(%arg0: i32, %arg1: i32) -> (i32, i32, i32, i32) {
    %c0_i32 = arith.constant 0 : i32
    %c0_i32_0 = arith.constant 0 : i32
    %c0_i32_1 = arith.constant 0 : i32
    %c0_i32_2 = arith.constant 0 : i32
    %c0_i32_3 = arith.constant 0 : i32
    return %c0_i32, %c0_i32_0, %c0_i32_1, %c0_i32_2 : i32, i32, i32, i32
  }
  func.func @transform_4(%arg0: i32, %arg1: i32) -> (i32, i32, i32, i32) {
    %c0_i32 = arith.constant 0 : i32
    %c0_i32_0 = arith.constant 0 : i32
    %c0_i32_1 = arith.constant 0 : i32
    %c0_i32_2 = arith.constant 0 : i32
    %c0_i32_3 = arith.constant 0 : i32
    return %c0_i32, %c0_i32_0, %c0_i32_1, %c0_i32_2 : i32, i32, i32, i32
  }
  func.func @transform_5(%arg0: i32, %arg1: i32) -> (i32, i32, i32, i32) {
    %c0_i32 = arith.constant 0 : i32
    %c0_i32_0 = arith.constant 0 : i32
    %c0_i32_1 = arith.constant 0 : i32
    %c0_i32_2 = arith.constant 0 : i32
    %c0_i32_3 = arith.constant 0 : i32
    return %c0_i32, %c0_i32_0, %c0_i32_1, %c0_i32_2 : i32, i32, i32, i32
  }
  func.func @transform_6(%arg0: i32, %arg1: i32) -> (i32, i32, i32, i32) {
    %c0_i32 = arith.constant 0 : i32
    %c0_i32_0 = arith.constant 0 : i32
    %c0_i32_1 = arith.constant 0 : i32
    %c0_i32_2 = arith.constant 0 : i32
    %c0_i32_3 = arith.constant 0 : i32
    return %c0_i32, %c0_i32_0, %c0_i32_1, %c0_i32_2 : i32, i32, i32, i32
  }
  func.func @transform_7(%arg0: i32, %arg1: i32) -> (i32, i32) {
    %c0_i32 = arith.constant 0 : i32
    %c0_i32_0 = arith.constant 0 : i32
    %c0_i32_1 = arith.constant 0 : i32
    return %c0_i32, %c0_i32_0 : i32, i32
  }
  func.func @transform_8(%arg0: i32, %arg1: i32) -> (i32, i32, i32) {
    %c0_i32 = arith.constant 0 : i32
    %c0_i32_0 = arith.constant 0 : i32
    %c0_i32_1 = arith.constant 0 : i32
    return %arg0, %c0_i32, %c0_i32_0 : i32, i32, i32
  }
}

</mosaic_0001>

<bundles_post_ra>
// kernel: tpu_custom_call.1
= control target key start
LH: loop header
LB: loop body
LE: loop exit
PB: predicated region body
PF: predicated region fallthrough
CT: control target
= control target key end

     0   :  { %13 = vsyncpa [#allocation4], 0  ;;  %s2677_s0 = inlined_call_operand.vmem [shape: bf16[2,8,32], index: 0, kind: input, shape index: {}]   ;;  %s2678_s1 = inlined_call_operand.vmem [shape: bf16[2,8,32], index: 1, kind: input, shape index: {}]   ;;  %s2679_s2 = inlined_call_operand.vmem [shape: bf16[2,8,32], index: 2, kind: input, shape index: {}]   ;;  %s2680_s3 = inlined_call_operand.vmem [shape: bf16[1,4,32,8], index: 3, kind: input, shape index: {}]   ;;  %s2681_s4 = inlined_call_operand.vmem [shape: bf16[1,4,32,8], index: 4, kind: input, shape index: {}]   ;;  %s2682_s5 = inlined_call_operand.vmem [shape: bf16[1,4,32,8], index: 5, kind: input, shape index: {}]   ;;  %s2683_s6 = inlined_call_operand.vmem [shape: bf16[1,4,8,32], index: 6, kind: input, shape index: {}]   ;;  %s2684_s7 = inlined_call_operand.vmem [shape: f32[1,32], index: 7, kind: input, shape index: {}]   ;;  %s2685_s8 = inlined_call_operand.hbm [shape: f32[2,8,32], index: 8, kind: output, shape index: {}]  }
   0x1   :  { %15 = vsyncpa [#allocation4 + $0x1], 0  ;;  %s2325_s27 = smov 0   ;;  %s2327_s28 = smov 0  }
   0x2   :  { %s2329_s29 = smov 0   ;;  %s2331_s30 = smov 0  }
   0x3   :  { %s2333_s9 = smov 0   ;;  %s2335_s10 = smov 0  }
   0x4 LB: > { %s1810_s11 = sadd.s32 4294967295, %s2275_s10   ;;  %s1811_s12 = sadd.s32 4294967294, %s2275_s10   ;;  %s2275_s10 = sphi %s2335_s10, %s21_s10   ;;  %s2271_s9 = sphi %s2333_s9, %s2692_s9   ;;  %s2267_s30 = sphi %s2331_s30, %s2691_s30   ;;  %s2263_s29 = sphi %s2329_s29, %s2690_s29   ;;  %s2259_s28 = sphi %s2327_s28, %s2689_s28   ;;  %s2255_s27 = sphi %s2325_s27, %s2688_s27  }
   0x5   : > { %s33_s13 = sadd.s32 1, %s2271_s9  ;;  %s223_s14 = sadd.s32 1, %s2263_s29 }
   0x6   : > { %p35_p0 = scmp.ge.s32.totalorder %s33_s13, 2  ;;  %p233_p1 = scmp.ne.s32.totalorder %s2263_s29, %s2259_s28 }
   0x7   : > { %p234_p2 = scmp.eq.s32.totalorder %s1810_s11, 1  ;;  %p239_p3 = scmp.ne.s32.totalorder %s2259_s28, %s2255_s27 }
   0x8   : > { %s2694_s13 = smov (%p35_p0, %s33_s13), 0  ;;  %p240_p5 = scmp.eq.s32.totalorder %s1811_s12, 1 }
   0x9   : > { %p2365_p4 = por %p234_p2, %p233_p1  ;;  %s220_s16 = ssub.s32 %s2271_s9, %s2694_s13 }
   0xa   : > { %p1814_p6 = scmp.ge.s32.totalorder %s2275_s10, 1  ;;  %p221_p7 = scmp.eq.s32.totalorder %s220_s16, 0 }
   0xb   : > { %p2372_p8 = por %p240_p5, %p239_p3  ;;  %p294_p9 = scmp.lt.s32.totalorder %s2275_s10, 3 }
   0xc   : > { %s2378_s18 = scalar_select %p221_p7, %s2263_s29, %s223_s14  }
   0xd   : > { %p295_p10 = pnand %p1814_p6, %p294_p9 }
   0xe   : > { %v2157_v0 = vld [vmem:[%s2680_s3] sm:$0xff] (!%p295_p10)   ;;  %v2277_v1 = vmov (!%p295_p10), 0.0   ;;  %v2158_v2 = vld [vmem:[%s2680_s3 + $0x10] sm:$0xff] (!%p295_p10)   ;;  %v2159_v3 = vld [vmem:[%s2680_s3 + $0x8] sm:$0xff] (!%p295_p10)   ;;  %vm2278_vm0 = vmmov (!%p295_p10), 0   ;;  %p335_p11 = scmp.lt.s32.totalorder (!%p295_p10), %s2267_s30, 1 }
   0xf   : > { %298 = sbr.rel (%p295_p10) target bundleno = 1258 (0x4ea), region = 52  ;;  %1932 = vmatprep.subr.bf16.mxu0 (!%p295_p10), %v2277_v1  ;;  %1940 = vmatprep.subr.bf16.mxu1 (!%p295_p10), %v2277_v1  ;;  %v2160_v4 = vld [vmem:[%s2680_s3 + $0x18] sm:$0xff] (!%p295_p10)   ;;  %vm425_vm1 = vcmask (!%p295_p10), 261120   ;;  %v2161_v5 = vld [vmem:[%s2680_s3 + $0x20] sm:$0xff] (!%p295_p10)   ;;  %v2162_v6 = vld [vmem:[%s2680_s3 + $0x30] sm:$0xff] (!%p295_p10)   ;;  %vm1055_vm2 = vcmask (!%p295_p10), 64512  }
  0x10   : > { %1933 = vmatpush3.bf16.msra.mxu0 (!%p295_p10), %v2157_v0  ;;  %1936 = vmatprep.mubr.msk.bf16.mxu0 (!%p295_p10), %vm2278_vm0, %v2277_v1  ;;  %v2163_v8 = vld [vmem:[%s2680_s3 + $0x28] sm:$0xff] (!%p295_p10)   ;;  %v2164_v9 = vld [vmem:[%s2680_s3 + $0x38] sm:$0xff] (!%p295_p10)   ;;  %v2165_v10 = vld [vmem:[%s2681_s4] sm:$0xff] (!%p295_p10)   ;;  %vm1295_vm3 = vcmask (!%p295_p10), 1043456  }
  0x11   : > { %1941 = vmatpush3.bf16.msra.mxu1 (!%p295_p10), %v2158_v2  ;;  %1934 = vmatprep.subr.bf16.mxu0 (!%p295_p10), %v2277_v1  ;;  %v2166_v11 = vld [vmem:[%s2681_s4 + $0x10] sm:$0xff] (!%p295_p10)   ;;  %v2167_v12 = vld [vmem:[%s2681_s4 + $0x8] sm:$0xff] (!%p295_p10)   ;;  %v2168_v13 = vld [vmem:[%s2681_s4 + $0x18] sm:$0xff] (!%p295_p10)  }
  0x12   : > { %1942 = vmatprep.subr.bf16.mxu1 (!%p295_p10), %v2277_v1  ;;  %1944 = vmatprep.mubr.msk.bf16.mxu1 (!%p295_p10), %vm2278_vm0, %v2277_v1  ;;  %v2169_v15 = vld [vmem:[%s2681_s4 + $0x20] sm:$0xff] (!%p295_p10)   ;;  %v2170_v16 = vld [vmem:[%s2681_s4 + $0x30] sm:$0xff] (!%p295_p10)   ;;  %v2171_v17 = vld [vmem:[%s2681_s4 + $0x28] sm:$0xff] (!%p295_p10)  }
  0x13   : > { %v2172_v18 = vld [vmem:[%s2681_s4 + $0x38] sm:$0xff] (!%p295_p10)   ;;  %v2173_v19 = vld [vmem:[%s2682_s5] sm:$0xff] (!%p295_p10)   ;;  %v2174_v20 = vld [vmem:[%s2682_s5 + $0x10] sm:$0xff] (!%p295_p10)  }
  0x14   : > { %1935 = vmatpush3.bf16.msra.mxu0 (!%p295_p10), %v2159_v3  ;;  %v2175_v21 = vld [vmem:[%s2682_s5 + $0x8] sm:$0xff] (!%p295_p10)   ;;  %v2176_v22 = vld [vmem:[%s2682_s5 + $0x18] sm:$0xff] (!%p295_p10)   ;;  %v2177_v24 = vld [vmem:[%s2682_s5 + $0x20] sm:$0xff] (!%p295_p10)  }
  0x15   : > { %1943 = vmatpush3.bf16.msra.mxu1 (!%p295_p10), %v2160_v4  ;;  %1948 = vmatprep.subr.bf16.mxu0 (!%p295_p10), %v2277_v1  ;;  %v2178_v25 = vld [vmem:[%s2682_s5 + $0x30] sm:$0xff] (!%p295_p10)   ;;  %v2179_v26 = vld [vmem:[%s2682_s5 + $0x28] sm:$0xff] (!%p295_p10)   ;;  %v2180_v27 = vld [vmem:[%s2682_s5 + $0x38] sm:$0xff] (!%p295_p10)  }
  0x16   : > { %s336_s11 = scalar_select %p335_p11, %s2267_s30, 1  ;;  %1956 = vmatprep.subr.bf16.mxu1 %v2277_v1 }
  0x18   : > { %s2402_s12 = sshll.u32 %s336_s11, 2 }
  0x19   : > { %s338_s21 = scalar_lea.vmem %s2677_s0, %s2402_s12  ;;  %s342_s25 = scalar_lea.vmem %s2678_s1, %s2402_s12 }
  0x1a   : > { %v348_v7 = vld [vmem:[%s338_s21] sm:$0xf]  ;;  %s346_s24 = scalar_lea.vmem %s2679_s2, %s2402_s12  ;;  %s332_s12 = sand.u32 1, %s2259_s28  }
  0x1b   : > { %1937 = vmatmul.mubr.msk.bf16.vlgmr.msra.gmra.mrb[0].mxu0 %vm425_vm1, %v348_v7  ;;  %1945 = vmatmul.mubr.msk.bf16.vlgmr.msra.gmra.mrb[0].mxu1 %vm425_vm1, %v348_v7  ;;  %v349_v14 = vld [vmem:[%s342_s25] sm:$0xf]  ;;  %s1815_s16 = sshll.u32 %s332_s12, 3  ;;  %s1869_s21 = sshll.u32 %s2267_s30, 7 }
  0x1c   : > { %1949 = vmatpush3.bf16.msra.mxu0 %v2161_v5  ;;  %1957 = vmatpush3.bf16.msra.mxu1 %v2162_v6  ;;  %v350_v23 = vld [vmem:[%s346_s24] sm:$0xf]  ;;  %s334_s22 = scalar_lea.vmem [#allocation3], %s1815_s16  ;;  %s2629_s26 = scalar_lea.hbm %s2685_s8, %s1869_s21 }
  0x1d   : > { %1950 = vmatprep.subr.bf16.mxu0 %v2277_v1  ;;  %1958 = vmatprep.subr.bf16.mxu1 %v2277_v1  ;;  %s1711_s23 = sshll.u32 %s334_s22, 4  ;;  %s1698_s11 = scalar_lea.sflag [#allocation4], %s332_s12  ;;  %s2631_s23 = int_to_ptr.vmem [resolvable:$true] %s1711_s23 }
  0x1e   : > { %1952 = vmatprep.mubr.msk.bf16.mxu0 %vm2278_vm0, %v2277_v1  ;;  %1960 = vmatprep.mubr.msk.bf16.mxu1 %vm2278_vm0, %v2277_v1  ;;  %s2197_s14 = scalar_lea.vmem %s2631_s23, 128  ;;  %s2279_s30 = smov [#allocation3]  }
  0x1f   : > { %p2198_p12 = scmp.ne.s32.totalorder %s2631_s23, %s2197_s14  ;;  %s2201_s16 = sshll.u32 %s2279_s30, 4  ;;  %s2202_s16 = int_to_ptr.vmem [resolvable:$false] %s2201_s16 }
  0x20   : > { %1951 = vmatpush3.bf16.msra.mxu0 %v2163_v8  ;;  %1959 = vmatpush3.bf16.msra.mxu1 %v2164_v9  ;;  %s2203_s19 = scalar_lea.vmem %s2202_s16, 256  ;;  %p2204_p1 = scmp.lt.s32.totalorder %s2631_s23, %s2202_s16 }
  0x21   : > { %1964 = vmatprep.subr.bf16.mxu0 %v2277_v1  ;;  %1972 = vmatprep.subr.bf16.mxu1 %v2277_v1  ;;  %p2199_p13 = pnand %p2198_p12, %p2365_p4  ;;  %p2205_p2 = scmp.lt.s32.totalorder %s2203_s19, %s2197_s14 }
  0x23   : > { %1953 = vmatmul.mubr.msk.bf16.vlgmr.msra.gmra.mrb[4].mxu0 %vm425_vm1, %v348_v7  ;;  %1961 = vmatmul.mubr.msk.bf16.vlgmr.msra.gmra.mrb[4].mxu1 %vm425_vm1, %v348_v7  ;;  %p2200_p0 = pneg %p2199_p13  ;;  %p2206_p3 = por %p2205_p2, %p2204_p1 }
  0x24   : > { %1965 = vmatpush3.bf16.msra.mxu0 %v2165_v10  ;;  %1973 = vmatpush3.bf16.msra.mxu1 %v2166_v11 }
  0x25   : > { %1966 = vmatprep.subr.bf16.mxu0 %v2277_v1  ;;  %1974 = vmatprep.subr.bf16.mxu1 %v2277_v1  ;;  %p2207_p5 = pnand %p2206_p3, %p2200_p0 }
  0x26   : > { %1968 = vmatprep.mubr.msk.bf16.mxu0 %vm2278_vm0, %v2277_v1  ;;  %1976 = vmatprep.mubr.msk.bf16.mxu1 %vm2278_vm0, %v2277_v1 }
  0x28   : > { %1967 = vmatpush3.bf16.msra.mxu0 %v2167_v12  ;;  %1975 = vmatpush3.bf16.msra.mxu1 %v2168_v13 }
  0x29   : > { %1980 = vmatprep.subr.bf16.mxu0 %v2277_v1  ;;  %1988 = vmatprep.subr.bf16.mxu1 %v2277_v1 }
  0x2b   : > { %1969 = vmatmul.mubr.msk.bf16.vlgmr.msra.gmra.mrb[8].mxu0 %vm425_vm1, %v349_v14  ;;  %1977 = vmatmul.mubr.msk.bf16.vlgmr.msra.gmra.mrb[8].mxu1 %vm425_vm1, %v349_v14 }
  0x2c   : > { %1981 = vmatpush3.bf16.msra.mxu0 %v2169_v15  ;;  %1989 = vmatpush3.bf16.msra.mxu1 %v2170_v16 }
  0x2d   : > { %1982 = vmatprep.subr.bf16.mxu0 %v2277_v1  ;;  %1990 = vmatprep.subr.bf16.mxu1 %v2277_v1 }
  0x2e   : > { %1984 = vmatprep.mubr.msk.bf16.mxu0 %vm2278_vm0, %v2277_v1  ;;  %1992 = vmatprep.mubr.msk.bf16.mxu1 %vm2278_vm0, %v2277_v1 }
  0x30   : > { %1983 = vmatpush3.bf16.msra.mxu0 %v2171_v17  ;;  %1991 = vmatpush3.bf16.msra.mxu1 %v2172_v18 }
  0x31   : > { %1996 = vmatprep.subr.bf16.mxu0 %v2277_v1  ;;  %2004 = vmatprep.subr.bf16.mxu1 %v2277_v1 }
  0x33   : > { %1985 = vmatmul.mubr.msk.bf16.vlgmr.msra.gmra.mrb[12].mxu0 %vm425_vm1, %v349_v14  ;;  %1993 = vmatmul.mubr.msk.bf16.vlgmr.msra.gmra.mrb[12].mxu1 %vm425_vm1, %v349_v14 }
  0x34   : > { %1997 = vmatpush3.bf16.msra.mxu0 %v2173_v19  ;;  %2005 = vmatpush3.bf16.msra.mxu1 %v2174_v20 }
  0x35   : > { %1998 = vmatprep.subr.bf16.mxu0 %v2277_v1  ;;  %2006 = vmatprep.subr.bf16.mxu1 %v2277_v1 }
  0x36   : > { %2000 = vmatprep.mubr.msk.bf16.mxu0 %vm2278_vm0, %v2277_v1  ;;  %2008 = vmatprep.mubr.msk.bf16.mxu1 %vm2278_vm0, %v2277_v1 }
  0x38   : > { %1999 = vmatpush3.bf16.msra.mxu0 %v2175_v21  ;;  %2007 = vmatpush3.bf16.msra.mxu1 %v2176_v22 }
  0x39   : > { %2012 = vmatprep.subr.bf16.mxu0 %v2277_v1  ;;  %2020 = vmatprep.subr.bf16.mxu1 %v2277_v1 }
  0x3b   : > { %2001 = vmatmul.mubr.msk.bf16.vlgmr.msra.gmra.mrb[16].mxu0 %vm425_vm1, %v350_v23  ;;  %2009 = vmatmul.mubr.msk.bf16.vlgmr.msra.gmra.mrb[16].mxu1 %vm425_vm1, %v350_v23 }
  0x3c   : > { %2013 = vmatpush3.bf16.msra.mxu0 %v2177_v24  ;;  %2016 = vmatprep.mubr.msk.bf16.mxu0 %vm2278_vm0, %v2277_v1 }
  0x3d   : > { %2014 = vmatprep.subr.bf16.mxu0 %v2277_v1  ;;  %2021 = vmatpush3.bf16.msra.mxu1 %v2178_v25 }
  0x3e   : > { %2024 = vmatprep.mubr.msk.bf16.mxu1 %vm2278_vm0, %v2277_v1  ;;  %2022 = vmatprep.subr.bf16.mxu1 %v2277_v1 }
  0x40   : > { %2015 = vmatpush3.bf16.msra.mxu0 %v2179_v26 }
  0x41   : > { %2023 = vmatpush3.bf16.msra.mxu1 %v2180_v27  ;;  %2028 = vmatprep.subr.bf16.mxu0 %v2277_v1 }
  0x42   : > { %2034 = vmatprep.subr.bf16.mxu1 %v2277_v1 }
  0x43   : > { %2017 = vmatmul.mubr.msk.bf16.vlgmr.msra.gmra.mrb[20].mxu0 %vm425_vm1, %v350_v23 }
  0x44   : > { %2025 = vmatmul.mubr.msk.bf16.vlgmr.msra.gmra.mrb[20].mxu1 %vm425_vm1, %v350_v23  ;;  %2030 = vmatprep.mubr.msk.bf16.mxu0 %vm2278_vm0, %v2277_v1 }
  0x45   : > { %2036 = vmatprep.mubr.msk.bf16.mxu1 %vm2278_vm0, %v2277_v1 }
  0xee   : > { %v463_v28 = vpop.f32.mrb[0].mxu0  ;;  %v515_v30 = vpop.f32.mrb[0].mxu1 }
  0xef   : > { %v1938_v29 = vpop.f32.mrb[1].mxu0  ;;  %v1946_v32 = vpop.f32.mrb[1].mxu1  ;;  %v1047_v57 = vpack.c.bf16 %v463_v28, %v463_v28  ;;  %v1048_v61 = vpack.c.bf16 %v515_v30, %v515_v30 }
  0xf0   : > { %v466_v31 = vpop.f32.mrb[2].mxu0  ;;  %v518_v34 = vpop.f32.mrb[2].mxu1 }
  0xf1   : > { %v1939_v33 = vpop.f32.mrb[3].mxu0  ;;  %v1947_v35 = vpop.f32.mrb[3].mxu1 }
  0xf6   : > { %v567_v36 = vpop.f32.mrb[4].mxu0  ;;  %v619_v38 = vpop.f32.mrb[4].mxu1 }
  0xf7   : > { %v1954_v37 = vpop.f32.mrb[5].mxu0  ;;  %v1962_v40 = vpop.f32.mrb[5].mxu1  ;;  %v1049_v7 = vpack.c.bf16 %v567_v36, %v567_v36  ;;  %v1050_v8 = vpack.c.bf16 %v619_v38, %v619_v38 }
  0xf8   : > { %v570_v39 = vpop.f32.mrb[6].mxu0  ;;  %v622_v42 = vpop.f32.mrb[6].mxu1 }
  0xf9   : > { %v1955_v41 = vpop.f32.mrb[7].mxu0  ;;  %v1963_v43 = vpop.f32.mrb[7].mxu1 }
  0xfe   : > { %v674_v44 = vpop.f32.mrb[8].mxu0  ;;  %v726_v46 = vpop.f32.mrb[8].mxu1 }
  0xff   : > { %v1051_v45 = vpack.c.bf16 %v674_v44, %v674_v44  ;;  %v1970_v47 = vpop.f32.mrb[9].mxu0  ;;  %v1052_v48 = vpack.c.bf16 %v726_v46, %v726_v46  ;;  %v1978_v50 = vpop.f32.mrb[9].mxu1 }
 0x100   : > { %v677_v49 = vpop.f32.mrb[10].mxu0  ;;  %v729_v53 = vpop.f32.mrb[10].mxu1 }
 0x101   : > { %v1060_v51 = vsel %vm1055_vm2, %v1051_v45, 0  ;;  %v1971_v52 = vpop.f32.mrb[11].mxu0  ;;  %v1106_v54 = vsel %vm1055_vm2, %v1052_v48, 0  ;;  %v1979_v55 = vpop.f32.mrb[11].mxu1 }
 0x102   : > { %2029 = vmatpush3.bf16.xpose.msra.mxu0 %v1060_v51  ;;  %2035 = vmatpush3.bf16.xpose.msra.mxu1 %v1106_v54 }
 0x103   : > { %2040 = vmatprep.subr.bf16.mxu0 %v2277_v1  ;;  %2046 = vmatprep.subr.bf16.mxu1 %v2277_v1 }
 0x106   : > { %v778_v56 = vpop.f32.mrb[12].mxu0  ;;  %v830_v59 = vpop.f32.mrb[12].mxu1 }
 0x107   : > { %v1053_v58 = vpack.c.bf16 %v778_v56, %v778_v56  ;;  %v1986_v60 = vpop.f32.mrb[13].mxu0  ;;  %v1054_v62 = vpack.c.bf16 %v830_v59, %v830_v59  ;;  %v1994_v0 = vpop.f32.mrb[13].mxu1 }
 0x108   : > { %v781_v63 = vpop.f32.mrb[14].mxu0  ;;  %v833_v4 = vpop.f32.mrb[14].mxu1 }
 0x109   : > { %v1152_v2 = vsel %vm1055_vm2, %v1053_v58, 0  ;;  %v1987_v3 = vpop.f32.mrb[15].mxu0  ;;  %2031 = vmatmul.mubr.msk.bf16.vlgmr.msra.gmra.mrb[24].mxu0 %vm1055_vm2, %v1047_v57  ;;  %v1198_v5 = vsel %vm1055_vm2, %v1054_v62, 0  ;;  %2037 = vmatmul.mubr.msk.bf16.vlgmr.msra.gmra.mrb[24].mxu1 %vm1055_vm2, %v1048_v61  ;;  %v1995_v6 = vpop.f32.mrb[15].mxu1 }
 0x10a   : > { %2041 = vmatpush3.bf16.xpose.msra.mxu0 %v1152_v2  ;;  %2047 = vmatpush3.bf16.xpose.msra.mxu1 %v1198_v5 }
 0x10b   : > { %2042 = vmatprep.mubr.msk.bf16.mxu0 %vm2278_vm0, %v2277_v1  ;;  %2048 = vmatprep.mubr.msk.bf16.mxu1 %vm2278_vm0, %v2277_v1 }
 0x10c   : > { %2052 = vmatprep.subr.bf16.mxu0 %v2277_v1  ;;  %2058 = vmatprep.subr.bf16.mxu1 %v2277_v1 }
 0x10e   : > { %v885_v9 = vpop.f32.mrb[16].mxu0  ;;  %v937_v13 = vpop.f32.mrb[16].mxu1 }
 0x10f   : > { %v1288_v10 = vpack.c.bf16 %v885_v9, %v885_v9  ;;  %v2002_v11 = vpop.f32.mrb[17].mxu0  ;;  %v1289_v16 = vpack.c.bf16 %v937_v13, %v937_v13  ;;  %v2010_v17 = vpop.f32.mrb[17].mxu1 }
 0x110   : > { %v888_v12 = vpop.f32.mrb[18].mxu0  ;;  %v940_v18 = vpop.f32.mrb[18].mxu1 }
 0x111   : > { %2043 = vmatmul.mubr.msk.bf16.vlgmr.msra.gmra.mrb[28].mxu0 %vm1055_vm2, %v1049_v7  ;;  %2049 = vmatmul.mubr.msk.bf16.vlgmr.msra.gmra.mrb[28].mxu1 %vm1055_vm2, %v1050_v8  ;;  %v1297_v14 = vsel %vm1295_vm3, %v1288_v10, 0  ;;  %v2003_v15 = vpop.f32.mrb[19].mxu0  ;;  %v1343_v19 = vsel %vm1295_vm3, %v1289_v16, 0  ;;  %v2011_v20 = vpop.f32.mrb[19].mxu1 }
 0x112   : > { %2054 = vmatprep.mubr.msk.bf16.mxu0 %vm2278_vm0, %v2277_v1  ;;  %2060 = vmatprep.mubr.msk.bf16.mxu1 %vm2278_vm0, %v2277_v1  ;;  %v409_v20 = vld [vmem:[%s2683_s6] sm:$0xf] }
 0x113   : > { %2053 = vmatpush3.bf16.msra.mxu0 %v1297_v14  ;;  %2059 = vmatpush3.bf16.msra.mxu1 %v1343_v19 }
 0x114   : > { %2064 = vmatprep.subr.bf16.mxu0 %v2277_v1  ;;  %2070 = vmatprep.subr.bf16.mxu1 %v2277_v1 }
 0x116   : > { %v2558_v21 = vpop.f32.mrb[20].mxu0 }
 0x117   : > { %v2560_v22 = vpop.f32.mrb[20].mxu1  ;;  %v2018_v23 = vpop.f32.mrb[21].mxu0  ;;  %v1290_v10 = vpack.c.bf16 %v2558_v21, %v2558_v21 }
 0x118   : > { %v2026_v24 = vpop.f32.mrb[21].mxu1  ;;  %v992_v25 = vpop.f32.mrb[22].mxu0  ;;  %v1291_v16 = vpack.c.bf16 %v2560_v22, %v2560_v22 }
 0x119   : > { %v1044_v26 = vpop.f32.mrb[22].mxu1  ;;  %v2019_v27 = vpop.f32.mrb[23].mxu0  ;;  %v1389_v15 = vsel %vm1295_vm3, %v1290_v10, 0  ;;  %v1485_v24 = vsel %vm1295_vm3, %v409_v20, 0 }
 0x11a   : > { %v2027_v28 = vpop.f32.mrb[23].mxu1  ;;  %v1435_v21 = vsel %vm1295_vm3, %v1291_v16, 0 }
 0x11b   : > { %v410_v28 = vld [vmem:[%s2683_s6 + $0x4] sm:$0xf] }
 0x1dc   : > { %v1096_v29 = vpop.f32.mrb[24].mxu0  ;;  %v1142_v30 = vpop.f32.mrb[24].mxu1 }
 0x1dd   : > { %v2032_v31 = vpop.f32.mrb[25].mxu0  ;;  %v1240_v32 = vsel %vm1055_vm2, %v1096_v29, -inf  ;;  %v2038_v33 = vpop.f32.mrb[25].mxu1  ;;  %v1243_v38 = vsel %vm1055_vm2, %v1142_v30, -inf }
 0x1de   : > { %1241 = vmax.xlane.f32.xlu0 %v1240_v32  ;;  %v1099_v34 = vpop.f32.mrb[26].mxu0  ;;  %v1145_v35 = vpop.f32.mrb[26].mxu1 }
 0x1df   : > { %v2033_v36 = vpop.f32.mrb[27].mxu0  ;;  %v2039_v37 = vpop.f32.mrb[27].mxu1 }
 0x1e0   : > { %v412_v36 = vld [vmem:[%s2683_s6 + $0xc] sm:$0xf] }
 0x1e2   : > { %1244 = vmax.xlane.f32.xlu0 %v1243_v38 }
 0x1e4   : > { %v1188_v39 = vpop.f32.mrb[28].mxu0  ;;  %v1234_v40 = vpop.f32.mrb[28].mxu1 }
 0x1e5   : > { %v2044_v41 = vpop.f32.mrb[29].mxu0  ;;  %v1246_v42 = vsel %vm1055_vm2, %v1188_v39, -inf  ;;  %v2050_v43 = vpop.f32.mrb[29].mxu1  ;;  %v1249_v48 = vsel %vm1055_vm2, %v1234_v40, -inf }
 0x1e6   : > { %1247 = vmax.xlane.f32.xlu1 %v1246_v42  ;;  %v1191_v44 = vpop.f32.mrb[30].mxu0  ;;  %v1237_v45 = vpop.f32.mrb[30].mxu1  ;;  %v1623_v41 = vsel %vm1295_vm3, %v412_v36, 0 }
 0x1e7   : > { %v2045_v46 = vpop.f32.mrb[31].mxu0  ;;  %v2051_v47 = vpop.f32.mrb[31].mxu1 }
 0x1ea   : > { %1250 = vmax.xlane.f32.xlu1 %v1249_v48 }
 0x26b   : > { %v1242_v49 = vpop.xlane.xlu0 %1241 }
 0x26c   : > { %v1252_v50 = vsub.f32 %v1096_v29, %v1242_v49  ;;  %v1531_v29 = vsel %vm1295_vm3, %v410_v28, 0 }
 0x26e   : > { %v1256_v51 = vmul.f32 1.442695, %v1252_v50 }
 0x26f   : > { %v1245_v52 = vpop.xlane.xlu0 %1244 }
 0x270   : > { %2181 = vpow2.f32 %v1256_v51  ;;  %v1253_v53 = vsub.f32 %v1142_v30, %v1245_v52  ;;  %v411_v30 = vld [vmem:[%s2683_s6 + $0x8] sm:$0xf] }
 0x271   : > { %v1577_v34 = vsel %vm1295_vm3, %v411_v30, 0 }
 0x272   : > { %v1258_v54 = vmul.f32 1.442695, %v1253_v53 }
 0x273   : > { %v1248_v55 = vpop.xlane.xlu1 %1247 }
 0x274   : > { %2183 = vpow2.f32 %v1258_v54  ;;  %v1254_v56 = vsub.f32 %v1188_v39, %v1248_v55 }
 0x276   : > { %v1260_v57 = vmul.f32 1.442695, %v1254_v56 }
 0x277   : > { %v1251_v58 = vpop.xlane.xlu1 %1250 }
 0x278   : > { %2185 = vpow2.f32 %v1260_v57  ;;  %v1255_v59 = vsub.f32 %v1234_v40, %v1251_v58 }
 0x27a   : > { %v2182_v60 = vpop.eup %2181  ;;  %v1262_v61 = vmul.f32 1.442695, %v1255_v59 }
 0x27b   : > { %v1264_v62 = vsel %vm1055_vm2, %v2182_v60, 0.0 }
 0x27c   : > { %2187 = vpow2.f32 %v1262_v61  ;;  %1265 = vadd.xlane.f32.xlu0 %v1264_v62 }
 0x27e   : > { %v2184_v63 = vpop.eup %2183 }
 0x27f   : > { %v1267_v0 = vsel %vm1055_vm2, %v2184_v63, 0.0 }
 0x280   : > { %1268 = vadd.xlane.f32.xlu1 %v1267_v0 }
 0x282   : > { %v2186_v2 = vpop.eup %2185 }
 0x283   : > { %v1270_v3 = vsel %vm1055_vm2, %v2186_v2, 0.0 }
 0x284   : > { %1271 = vadd.xlane.f32.xlu0 %v1270_v3 }
 0x286   : > { %v2188_v4 = vpop.eup %2187 }
 0x287   : > { %v1273_v5 = vsel %vm1055_vm2, %v2188_v4, 0.0 }
 0x288   : > { %1274 = vadd.xlane.f32.xlu1 %v1273_v5 }
 0x309   : > { %v1266_v6 = vpop.xlane.xlu0 %1265 }
 0x30a   : > { %2189 = vrcp.f32 %v1266_v6 }
 0x30d   : > { %v1269_v7 = vpop.xlane.xlu1 %1268 }
 0x30e   : > { %2191 = vrcp.f32 %v1269_v7 }
 0x311   : > { %v1272_v8 = vpop.xlane.xlu0 %1271 }
 0x312   : > { %2193 = vrcp.f32 %v1272_v8 }
 0x314   : > { %v2190_v9 = vpop.eup %2189 }
 0x315   : > { %v1280_v11 = vmul.f32 %v2190_v9, %v2182_v60  ;;  %v1275_v12 = vpop.xlane.xlu1 %1274 }
 0x316   : > { %2195 = vrcp.f32 %v1275_v12 }
 0x317   : > { %v1284_v13 = vpack.c.bf16 %v1280_v11, %v1280_v11 }
 0x318   : > { %v2192_v14 = vpop.eup %2191 }
 0x319   : > { %v1281_v17 = vmul.f32 %v2192_v14, %v2184_v63  ;;  %2055 = vmatmul.mubr.msk.bf16.vlgmr.msra.gmra.mrb[32].mxu0 %vm1055_vm2, %v1284_v13  ;;  %v1867_v13 = vld [vmem:[%s2684_s7] ss:$0 sm:$0xff] }
 0x31a   : > { %2065 = vmatpush3.bf16.msra.mxu0 %v1389_v15  ;;  %2066 = vmatprep.mubr.msk.bf16.mxu0 %vm2278_vm0, %v2277_v1 }
 0x31b   : > { %v1285_v18 = vpack.c.bf16 %v1281_v17, %v1281_v17  ;;  %2076 = vmatprep.subr.bf16.mxu0 %v2277_v1 }
 0x31c   : > { %v2194_v19 = vpop.eup %2193 }
 0x31d   : > { %v1282_v23 = vmul.f32 %v2194_v19, %v2186_v2  ;;  %2061 = vmatmul.mubr.msk.bf16.vlgmr.msra.gmra.mrb[32].mxu1 %vm1055_vm2, %v1285_v18 }
 0x31e   : > { %2071 = vmatpush3.bf16.msra.mxu1 %v1435_v21  ;;  %2072 = vmatprep.mubr.msk.bf16.mxu1 %vm2278_vm0, %v2277_v1 }
 0x31f   : > { %v1286_v22 = vpack.c.bf16 %v1282_v23, %v1282_v23  ;;  %2082 = vmatprep.subr.bf16.mxu1 %v2277_v1 }
 0x320   : > { %v2196_v25 = vpop.eup %2195 }
 0x321   : > { %v1283_v26 = vmul.f32 %v2196_v25, %v2188_v4  ;;  %2067 = vmatmul.mubr.msk.bf16.vlgmr.msra.gmra.mrb[36].mxu0 %vm1055_vm2, %v1286_v22 }
 0x322   : > { %2077 = vmatpush3.bf16.msra.mxu0 %v1485_v24  ;;  %2078 = vmatprep.mubr.msk.bf16.mxu0 %vm2278_vm0, %v2277_v1 }
 0x323   : > { %v1287_v27 = vpack.c.bf16 %v1283_v26, %v1283_v26  ;;  %2088 = vmatprep.subr.bf16.mxu0 %v2277_v1 }
 0x325   : > { %2073 = vmatmul.mubr.msk.bf16.vlgmr.msra.gmra.mrb[36].mxu1 %vm1055_vm2, %v1287_v27 }
 0x326   : > { %2084 = vmatprep.mubr.msk.bf16.mxu1 %vm2278_vm0, %v2277_v1  ;;  %2083 = vmatpush3.bf16.msra.mxu1 %v1531_v29 }
 0x327   : > { %2094 = vmatprep.subr.bf16.mxu1 %v2277_v1 }
 0x3ec   : > { %v1333_v31 = vpop.f32.mrb[32].mxu0 }
 0x3ed   : > { %v1477_v32 = vpack.c.bf16 %v1333_v31, %v1333_v31  ;;  %v2056_v33 = vpop.f32.mrb[33].mxu0 }
 0x3ee   : > { %v1336_v35 = vpop.f32.mrb[34].mxu0 }
 0x3ef   : > { %v2057_v37 = vpop.f32.mrb[35].mxu0  ;;  %2079 = vmatmul.mubr.msk.bf16.vlgmr.msra.gmra.mrb[40].mxu0 %vm1055_vm2, %v1477_v32 }
 0x3f0   : > { %v1379_v38 = vpop.f32.mrb[32].mxu1  ;;  %2089 = vmatpush3.bf16.msra.mxu0 %v1577_v34  ;;  %2090 = vmatprep.mubr.msk.bf16.mxu0 %vm2278_vm0, %v2277_v1 }
 0x3f1   : > { %v1478_v39 = vpack.c.bf16 %v1379_v38, %v1379_v38  ;;  %v2062_v40 = vpop.f32.mrb[33].mxu1 }
 0x3f2   : > { %v1382_v42 = vpop.f32.mrb[34].mxu1 }
 0x3f3   : > { %v2063_v43 = vpop.f32.mrb[35].mxu1  ;;  %2085 = vmatmul.mubr.msk.bf16.vlgmr.msra.gmra.mrb[40].mxu1 %vm1055_vm2, %v1478_v39 }
 0x3f4   : > { %v1425_v44 = vpop.f32.mrb[36].mxu0  ;;  %2095 = vmatpush3.bf16.msra.mxu1 %v1623_v41  ;;  %2096 = vmatprep.mubr.msk.bf16.mxu1 %vm2278_vm0, %v2277_v1 }
 0x3f5   : > { %v1479_v45 = vpack.c.bf16 %v1425_v44, %v1425_v44  ;;  %v2068_v46 = vpop.f32.mrb[37].mxu0 }
 0x3f6   : > { %v1428_v47 = vpop.f32.mrb[38].mxu0 }
 0x3f7   : > { %v2069_v48 = vpop.f32.mrb[39].mxu0  ;;  %2091 = vmatmul.mubr.msk.bf16.vlgmr.msra.gmra.mrb[44].mxu0 %vm1055_vm2, %v1479_v45 }
 0x3f8   : > { %v1471_v49 = vpop.f32.mrb[36].mxu1 }
 0x3f9   : > { %v1480_v50 = vpack.c.bf16 %v1471_v49, %v1471_v49  ;;  %v2074_v51 = vpop.f32.mrb[37].mxu1 }
 0x3fa   : > { %v1474_v52 = vpop.f32.mrb[38].mxu1 }
 0x3fb   : > { %v2075_v53 = vpop.f32.mrb[39].mxu1  ;;  %2097 = vmatmul.mubr.msk.bf16.vlgmr.msra.gmra.mrb[44].mxu1 %vm1055_vm2, %v1480_v50 }
 0x4c2   : > { %v1521_v54 = vpop.f32.mrb[40].mxu0 }
 0x4c3   : > { %v2080_v55 = vpop.f32.mrb[41].mxu0  ;;  %v1665_v1 = vsel %vm425_vm1, %v1521_v54, 0.0 }
 0x4c4   : > { %v1524_v56 = vpop.f32.mrb[42].mxu0 }
 0x4c5   : > { %v2081_v57 = vpop.f32.mrb[43].mxu0 }
 0x4c6   : > { %v1567_v58 = vpop.f32.mrb[40].mxu1 }
 0x4c7   : > { %v1666_v59 = vsel %vm425_vm1, %v1567_v58, 0.0  ;;  %v2086_v60 = vpop.f32.mrb[41].mxu1 }
 0x4c8   : > { %v1667_v61 = vadd.f32 %v1666_v59, %v1665_v1  ;;  %v1570_v62 = vpop.f32.mrb[42].mxu1 }
 0x4c9   : > { %v2087_v63 = vpop.f32.mrb[43].mxu1 }
 0x4ca   : > { %v1613_v0 = vpop.f32.mrb[44].mxu0 }
 0x4cb   : > { %v1668_v2 = vsel %vm425_vm1, %v1613_v0, 0.0  ;;  %v2092_v3 = vpop.f32.mrb[45].mxu0 }
 0x4cc   : > { %v1669_v4 = vadd.f32 %v1668_v2, %v1667_v61  ;;  %v1616_v5 = vpop.f32.mrb[46].mxu0 }
 0x4cd   : > { %v2093_v6 = vpop.f32.mrb[47].mxu0 }
 0x4ce   : > { %v1659_v7 = vpop.f32.mrb[44].mxu1 }
 0x4cf   : > { %v1670_v8 = vsel %vm425_vm1, %v1659_v7, 0.0  ;;  %v2098_v9 = vpop.f32.mrb[45].mxu1 }
 0x4d0   : > { %v1671_v10 = vadd.f32 %v1670_v8, %v1669_v4  ;;  %v1662_v11 = vpop.f32.mrb[46].mxu1 }
 0x4d1   : > { %v2099_v12 = vpop.f32.mrb[47].mxu1 }
 0x4d2   : > { %1676 = vst.msk [vmem:[#allocation2] sm:$0xff] %vm425_vm1, %v1671_v10 }
 0x4d9   : > { %v1687_v14 = vld [vmem:[#allocation2] sm:$0xff] }
 0x4da   : > { %v1695_v15 = vadd.f32 %v1867_v13, %v1687_v14 }
 0x4dc   : > { %1696 = vst.msk [vmem:[%s334_s22] sm:$0xff] %vm425_vm1, %v1695_v15 }
 0x4dd   : > { %2210 = shalt.err (!%p2207_p5)
}
 0x4de   : > { %s2211_s12 = scalar_lea.hbm %s2629_s26, 128  ;;  %s2215_s22 = scalar_lea.hbm %s2685_s8, 256 }
 0x4df   : > { %p2212_p6 = scmp.ne.s32.totalorder %s2629_s26, %s2211_s12  ;;  %p2216_p10 = scmp.lt.u32.totalorder %s2629_s26, %s2685_s8 }
 0x4e0   : > { %p2217_p11 = scmp.lt.u32.totalorder %s2215_s22, %s2211_s12  ;;  %p2219_p13 = scmp.lt.u32.totalorder %s2211_s12, %s2629_s26 }
 0x4e1   : > { %p2213_p7 = pnand %p2212_p6, %p2365_p4 }
 0x4e2   : > { %p2218_p12 = por %p2217_p11, %p2216_p10 }
 0x4e3   : > { %p2214_p9 = pneg %p2213_p7 }
 0x4e4   : > { %p2220_p0 = por %p2219_p13, %p2218_p12 }
 0x4e6   : > { %p2221_p1 = pnand %p2220_p0, %p2214_p9 }
 0x4e8   : > { %2224 = shalt.err (!%p2221_p1)
}
 0x4e9   : > { %2100 = dma.vmem_to_hbm [thread:$0]  (%p2365_p4), %s2631_s23, 128, %s2629_s26, %s1698_s11  }
 0x4ea PF: > { %p2106_p2 = scmp.ge.s32.totalorder %s2275_s10, 2  ;;  %s1723_s14 = sand.u32 1, %s2255_s27  }
 0x4eb   : > { %s1724_s30 = scalar_lea.sflag [#allocation4], %s1723_s14 }
 0x4ec   : > { %p2103_p3 = pnand %p2106_p2, %p2372_p8 }
 0x4ee   : > { %2250 = dma.done.wait (!%p2103_p3), %s1724_s30, 128  }
 0x4ef   : > { %2252 = vsyncadd (!%p2103_p3), %s1724_s30, 4294967168  ;;  %s21_s10 = sadd.s32 1, %s2275_s10   ;;  %s2688_s27 = smov %s2259_s28 }
 0x4f0   : > { %p18_p5 = scmp.ge.s32.totalorder %s21_s10, 4   ;;  %s2689_s28 = smov %s2263_s29 }
 0x4f1   : > { %s2690_s29 = smov %s2378_s18  ;;  %s2691_s30 = smov %s2271_s9 }
 0x4f2   : > { %s2692_s9 = smov %s2694_s13  ;;  %20 = sbr.rel (!%p18_p5) target bundleno = 4 (0x4), region = 109 }
 0x4f9   :  { %1729 = vsyncpa [#allocation4], 1 }
 0x4fa   :  { %1731 = vsyncpa [#allocation4 + $0x1], 1 }

</bundles_post_ra>
